<compile_context>
chip_gen: v5e
topology: v5e:2x2
jax: 0.10.0
libtpu: 0.0.40
codegen_flags: <defaults>
</compile_context>

<pallas_src>
import functools

import jax
import jax.numpy as jnp
from jax.experimental import pallas as pl
from jax.experimental.pallas import tpu as pltpu

_EPS = 1e-6  # F.pairwise_distance default eps (added to the difference)


def _sia_loss_kernel(o1_ref, o2_ref, lbl_ref, out_ref, acc_ref, *,
                     margin, batch, tm):
    i = pl.program_id(0)

    @pl.when(i == 0)
    def _():
        acc_ref[...] = jnp.zeros_like(acc_ref)

    # Cast in-VMEM: HBM traffic stays at the input's native width.
    diff = (o1_ref[...].astype(jnp.float32)
            - o2_ref[...].astype(jnp.float32) + _EPS)           # (TM, D)
    d2 = jnp.sum(diff * diff, axis=-1, keepdims=True)           # (TM, 1)
    d = jnp.sqrt(d2)                                            # EUP slot
    lbl = lbl_ref[...].astype(jnp.float32)                      # (TM, 1)
    hinge = jnp.maximum(margin - d, 0.0)
    per_row = lbl * d2 + (1.0 - lbl) * (hinge * hinge)          # (TM, 1)

    # Zero-out rows past the true batch (padded tail tile); select, so any
    # garbage (inf/nan) in the padded region cannot leak into the sum.
    row_ids = i * tm + jax.lax.broadcasted_iota(jnp.int32, per_row.shape, 0)
    per_row = jnp.where(row_ids < batch, per_row, 0.0)

    acc_ref[...] += jnp.sum(per_row, keepdims=True)             # (1, 1)

    @pl.when(i == pl.num_programs(0) - 1)
    def _():
        out_ref[...] = acc_ref[...] * (1.0 / batch)


def sia_loss(output1, output2, label, margin=2.0):
    """Pallas implementation of SiaLoss.forward. Returns a scalar float32."""
    assert output1.shape == output2.shape and output1.ndim == 2
    B, D = output1.shape
    label2d = label.reshape(B, 1).astype(jnp.float32)

    # Tile sizing: two inputs x double-buffering -> 4 * TM * D * itemsize.
    # Budget ~8 MiB so it fits v5e's 16 MiB scoped-VMEM default with headroom
    # (also comfortably inside v6e/v7x limits).
    itemsize = jnp.dtype(output1.dtype).itemsize
    budget = 8 * 1024 * 1024
    tm = budget // max(1, 4 * D * itemsize)
    tm = int(max(8, min(tm, 1024)))
    tm -= tm % 8                              # keep (8, 128) tiling rule happy
    b_pad = ((B + 7) // 8) * 8
    tm = min(tm, b_pad)

    grid = (pl.cdiv(B, tm),)
    kernel = functools.partial(
        _sia_loss_kernel, margin=float(margin), batch=B, tm=tm)

    out = pl.pallas_call(
        kernel,
        out_shape=jax.ShapeDtypeStruct((1, 1), jnp.float32),
        grid_spec=pltpu.PrefetchScalarGridSpec(
            num_scalar_prefetch=0,
            grid=grid,
            in_specs=[
                pl.BlockSpec((tm, D), lambda i: (i, 0)),
                pl.BlockSpec((tm, D), lambda i: (i, 0)),
                pl.BlockSpec((tm, 1), lambda i: (i, 0)),
            ],
            out_specs=pl.BlockSpec((1, 1), lambda i: (0, 0)),
            scratch_shapes=[pltpu.VMEM((1, 1), jnp.float32)],
        ),
        compiler_params=pltpu.CompilerParams(
            dimension_semantics=("arbitrary",),  # reduction axis
            vmem_limit_bytes=16 * 1024 * 1024,
        ),
    )(output1, output2, label2d)
    return out[0, 0]


def _sia_loss_ref(output1, output2, label, margin=2.0):
    # Pure-JAX reference mirroring the PyTorch code, for verification.
    diff = output1.astype(jnp.float32) - output2.astype(jnp.float32) + _EPS
    d = jnp.sqrt(jnp.sum(diff * diff, axis=-1))
    loss = (label * d ** 2
            + (1.0 - label) * jnp.maximum(margin - d, 0.0) ** 2)
    return jnp.mean(loss)


if __name__ == "__main__":
    key = jax.random.PRNGKey(0)
    k1, k2, k3, k4, k5, k6 = jax.random.split(key, 6)

    # Small test consistent with the module's forward: (B, D) feature pairs.
    B, D = 8, 32
    output1 = jax.random.normal(k1, (B, D), dtype=jnp.float32)
    output2 = jax.random.normal(k2, (B, D), dtype=jnp.float32)
    label = jax.random.bernoulli(k3, p=0.5, shape=(B,)).astype(jnp.float32)

    loss = jax.block_until_ready(sia_loss(output1, output2, label, margin=2.0))
    ref = _sia_loss_ref(output1, output2, label, margin=2.0)
    assert jnp.allclose(loss, ref, rtol=1e-5, atol=1e-5), (loss, ref)

    # Second check: batch not a multiple of the tile/8 -> exercises masking.
    B2, D2 = 20, 48
    o1b = jax.random.normal(k4, (B2, D2), dtype=jnp.float32)
    o2b = jax.random.normal(k5, (B2, D2), dtype=jnp.float32)
    lblb = jax.random.bernoulli(k6, p=0.5, shape=(B2,)).astype(jnp.float32)

    loss2 = jax.block_until_ready(sia_loss(o1b, o2b, lblb, margin=2.0))
    ref2 = _sia_loss_ref(o1b, o2b, lblb, margin=2.0)
    assert jnp.allclose(loss2, ref2, rtol=1e-5, atol=1e-5), (loss2, ref2)

    print("KERNEL_OK")
</pallas_src>

<mosaic_0001>
module attributes {stable_mosaic.version = 11 : i64} {
  func.func @_sia_loss_kernel(%arg0: i32, %arg1: memref<8x32xf32, #tpu.memory_space<vmem>>, %arg2: memref<8x32xf32, #tpu.memory_space<vmem>>, %arg3: memref<8x1xf32, #tpu.memory_space<vmem>>, %arg4: memref<1x1xf32, #tpu.memory_space<vmem>>, %arg5: memref<1x1xf32, #tpu.memory_space<vmem>>) attributes {dimension_semantics = [#tpu.dimension_semantics<arbitrary>], iteration_bounds = array<i64: 1>, scalar_prefetch = 0 : i64, scratch_operands = 1 : i64, tpu.core_type = #tpu.core_type<tc>, window_params = [{transform_indices = @transform_0, window_bounds = array<i64: 8, 32>}, {transform_indices = @transform_1, window_bounds = array<i64: 8, 32>}, {transform_indices = @transform_2, window_bounds = array<i64: 8, 1>}, {pipeline_mode = #tpu.pipeline_mode<synchronous>, transform_indices = @transform_3, window_bounds = array<i64: 1, 1>}]} {
    %c0_i32 = arith.constant 0 : i32
    %0 = arith.cmpi eq, %arg0, %c0_i32 : i32
    %1 = arith.extui %0 : i1 to i32
    %c0_i32_0 = arith.constant 0 : i32
    %2 = arith.cmpi ne, %1, %c0_i32_0 : i32
    scf.if %2 {
      %cst_19 = arith.constant 0.000000e+00 : f32
      %42 = vector.broadcast %cst_19 : f32 to vector<1x1xf32>
      %c0_20 = arith.constant 0 : index
      %c0_21 = arith.constant 0 : index
      %43 = vector.load %arg5[%c0_20, %c0_21] : memref<1x1xf32, #tpu.memory_space<vmem>>, vector<1x1xf32>
      tpu.vector_store %arg5[%c0_20, %c0_21], %42 {strides = array<i32>} : memref<1x1xf32, #tpu.memory_space<vmem>>, vector<1x1xf32>,
    } else {
    }
    %c0 = arith.constant 0 : index
    %c0_1 = arith.constant 0 : index
    %3 = vector.load %arg1[%c0, %c0_1] : memref<8x32xf32, #tpu.memory_space<vmem>>, vector<8x32xf32>
    %c0_2 = arith.constant 0 : index
    %c0_3 = arith.constant 0 : index
    %4 = vector.load %arg2[%c0_2, %c0_3] : memref<8x32xf32, #tpu.memory_space<vmem>>, vector<8x32xf32>
    %5 = arith.subf %3, %4 : vector<8x32xf32>
    %cst = arith.constant 9.99999997E-7 : f32
    %6 = vector.broadcast %cst : f32 to vector<8x32xf32>
    %7 = arith.addf %5, %6 : vector<8x32xf32>
    %8 = arith.mulf %7, %7 : vector<8x32xf32>
    %cst_4 = arith.constant dense<0.000000e+00> : vector<8xf32>
    %9 = vector.multi_reduction <add>, %8, %cst_4 [1] : vector<8x32xf32> to vector<8xf32>
    %10 = vector.shape_cast %9 : vector<8xf32> to vector<8x1xf32>
    %11 = math.sqrt %10 : vector<8x1xf32>
    %c0_5 = arith.constant 0 : index
    %c0_6 = arith.constant 0 : index
    %12 = vector.load %arg3[%c0_5, %c0_6] : memref<8x1xf32, #tpu.memory_space<vmem>>, vector<8x1xf32>
    %cst_7 = arith.constant 2.000000e+00 : f32
    %13 = vector.broadcast %cst_7 : f32 to vector<8x1xf32>
    %14 = arith.subf %13, %11 : vector<8x1xf32>
    %cst_8 = arith.constant 0.000000e+00 : f32
    %15 = vector.broadcast %cst_8 : f32 to vector<8x1xf32>
    %16 = arith.maximumf %14, %15 : vector<8x1xf32>
    %17 = arith.mulf %12, %10 : vector<8x1xf32>
    %cst_9 = arith.constant 1.000000e+00 : f32
    %18 = vector.broadcast %cst_9 : f32 to vector<8x1xf32>
    %19 = arith.subf %18, %12 : vector<8x1xf32>
    %20 = arith.mulf %16, %16 : vector<8x1xf32>
    %21 = arith.mulf %19, %20 : vector<8x1xf32>
    %22 = arith.addf %17, %21 : vector<8x1xf32>
    %c8_i32 = arith.constant 8 : i32
    %23 = arith.muli %arg0, %c8_i32 : i32
    %24 = tpu.iota {dimensions = array<i32: 0>} : vector<8x1xi32>
    %25 = vector.broadcast %23 : i32 to vector<8x1xi32>
    %26 = arith.addi %25, %24 : vector<8x1xi32>
    %c8_i32_10 = arith.constant 8 : i32
    %27 = vector.broadcast %c8_i32_10 : i32 to vector<8x1xi32>
    %28 = arith.cmpi slt, %26, %27 : vector<8x1xi32>
    %cst_11 = arith.constant 0.000000e+00 : f32
    %29 = vector.broadcast %cst_11 : f32 to vector<8x1xf32>
    %30 = arith.select %28, %22, %29 : vector<8x1xi1>, vector<8x1xf32>
    %c0_12 = arith.constant 0 : index
    %c0_13 = arith.constant 0 : index
    %31 = vector.load %arg5[%c0_12, %c0_13] : memref<1x1xf32, #tpu.memory_space<vmem>>, vector<1x1xf32>
    %32 = vector.shape_cast %30 : vector<8x1xf32> to vector<1x8x1xf32>
    %cst_14 = arith.constant dense<0.000000e+00> : vector<1xf32>
    %33 = vector.multi_reduction <add>, %32, %cst_14 [1, 2] : vector<1x8x1xf32> to vector<1xf32>
    %34 = vector.shape_cast %33 : vector<1xf32> to vector<1x1x1xf32>
    %35 = vector.extract %34[0, 0, 0] : f32 from vector<1x1x1xf32>
    %36 = vector.broadcast %35 : f32 to vector<1x1xf32>
    %37 = arith.addf %31, %36 : vector<1x1xf32>
    %c0_15 = arith.constant 0 : index
    %c0_16 = arith.constant 0 : index
    %38 = vector.load %arg5[%c0_15, %c0_16] : memref<1x1xf32, #tpu.memory_space<vmem>>, vector<1x1xf32>
    tpu.vector_store %arg5[%c0_15, %c0_16], %37 {strides = array<i32>} : memref<1x1xf32, #tpu.memory_space<vmem>>, vector<1x1xf32>,
    %c0_i32_17 = arith.constant 0 : i32
    %39 = arith.cmpi eq, %arg0, %c0_i32_17 : i32
    %40 = arith.extui %39 : i1 to i32
    %c0_i32_18 = arith.constant 0 : i32
    %41 = arith.cmpi ne, %40, %c0_i32_18 : i32
    scf.if %41 {
      %c0_19 = arith.constant 0 : index
      %c0_20 = arith.constant 0 : index
      %42 = vector.load %arg5[%c0_19, %c0_20] : memref<1x1xf32, #tpu.memory_space<vmem>>, vector<1x1xf32>
      %cst_21 = arith.constant 1.250000e-01 : f32
      %43 = vector.broadcast %cst_21 : f32 to vector<1x1xf32>
      %44 = arith.mulf %42, %43 : vector<1x1xf32>
      %c0_22 = arith.constant 0 : index
      %c0_23 = arith.constant 0 : index
      %45 = vector.load %arg4[%c0_22, %c0_23] : memref<1x1xf32, #tpu.memory_space<vmem>>, vector<1x1xf32>
      tpu.vector_store %arg4[%c0_22, %c0_23], %44 {strides = array<i32>} : memref<1x1xf32, #tpu.memory_space<vmem>>, vector<1x1xf32>,
    } else {
    }
    return
  }
  func.func @transform_0(%arg0: i32) -> (i32, i32) {
    %c0_i32 = arith.constant 0 : i32
    %c0_i32_0 = arith.constant 0 : i32
    return %arg0, %c0_i32 : i32, i32
  }
  func.func @transform_1(%arg0: i32) -> (i32, i32) {
    %c0_i32 = arith.constant 0 : i32
    %c0_i32_0 = arith.constant 0 : i32
    return %arg0, %c0_i32 : i32, i32
  }
  func.func @transform_2(%arg0: i32) -> (i32, i32) {
    %c0_i32 = arith.constant 0 : i32
    %c0_i32_0 = arith.constant 0 : i32
    return %arg0, %c0_i32 : i32, i32
  }
  func.func @transform_3(%arg0: i32) -> (i32, i32) {
    %c0_i32 = arith.constant 0 : i32
    %c0_i32_0 = arith.constant 0 : i32
    %c0_i32_1 = arith.constant 0 : i32
    return %c0_i32, %c0_i32_0 : i32, i32
  }
}

</mosaic_0001>

<bundles_post_ra>
// kernel: tpu_custom_call.1
= control target key start
LH: loop header
LB: loop body
LE: loop exit
PB: predicated region body
PF: predicated region fallthrough
CT: control target
= control target key end

     0   :  { %8 = vsyncpa [#allocation4], 0  ;;  %s207_s0 = inlined_call_operand.vmem [shape: f32[8,32], index: 0, kind: input, shape index: {}]   ;;  %s208_s1 = inlined_call_operand.hbm [shape: f32[8,32], index: 1, kind: input, shape index: {}]   ;;  %s209_s2 = inlined_call_operand.vmem [shape: f32[8,1], index: 2, kind: input, shape index: {}]   ;;  %s210_s3 = inlined_call_operand.hbm [shape: f32[1,1], index: 3, kind: output, shape index: {}]  }
   0x1   :  { %9 = vsyncpa [#allocation5], 0  ;;  %s17_s14 = sshll.u32 %s208_s1, 4  ;;  %s169_s15 = smov [#allocation3]   ;;  %s18_s14 = int_to_ptr.hbm [resolvable:$true] %s17_s14 }
   0x2   :  { %s19_s16 = sshll.u32 %s169_s15, 4  ;;  %s20_s16 = int_to_ptr.vmem [resolvable:$true] %s19_s16 }
   0x3   :  { %22 = dma.hbm_to_vmem [thread:$0]  %s18_s14, 128, %s20_s16, [#allocation4]  }
   0x4   :  { %165 = dma.done.wait [#allocation4], 128  }
   0x5   :  { %166 = vsyncadd [#allocation4], 4294967168  ;;  %v35_v0 = vld [vmem:[%s207_s0] sm:$0xff]  ;;  %vm40_vm0 = vcmask 261120   ;;  %vm72_vm3 = vcmask 7168   ;;  %vm33_vm4 = vcmask 0  }
   0x6   :  { %v36_v1 = vld [vmem:[#allocation3] sm:$0xff]  ;;  %v170_v26 = vmov 0.0   ;;  %s171_s19 = smov [#allocation6]   ;;  %s100_s23 = sshll.u32 %s210_s3, 4  ;;  %s101_s23 = int_to_ptr.hbm [resolvable:$true] %s100_s23 }
   0x7   :  { %v37_v2 = vsub.f32 %v35_v0, %v36_v1  ;;  %v56_v18 = vld [vmem:[%s209_s2] sm:$0xff]  ;;  %34 = vst.msk [vmem:[#allocation2] sm:$0x1] %vm33_vm4, %v170_v26  ;;  %s98_s20 = sshll.u32 %s171_s19, 4  ;;  %s99_s20 = int_to_ptr.vmem [resolvable:$true] %s98_s20 }
   0x8   :  { %v60_v20 = vsub.f32 1.0, %v56_v18 }
   0x9   :  { %v38_v3 = vadd.f32 1e-06, %v37_v2 }
   0xb   :  { %v39_v4 = vmul.f32 %v38_v3, %v38_v3 }
   0xd   :  { %v41_v5 = vsel %vm40_vm0, %v39_v4, 0.0 }
   0xe   :  { %42 = vadd.xlane.f32.xlu0 %v41_v5  ;;  %v71_v34 = vld [vmem:[#allocation2] sm:$0x1] }
  0x81   :  { %v43_v6 = vpop.xlane.xlu0 %42 }
  0x82   :  { %115 = vrsqrt.f32 %v43_v6  ;;  %vm51_vm1 = vcmp.eq.f32.partialorder %v43_v6, inf  ;;  %v54_v14 = vand.u32 2147483648, %v43_v6  ;;  %vm53_vm2 = vcmp.eq.f32.partialorder %v43_v6, 0.0 }
  0x83   :  { %v59_v22 = vmul.f32 %v56_v18, %v43_v6 }
  0x88   :  { %v116_v7 = vpop.eup %115 }
  0x89   :  { %v45_v8 = vmul.f32 %v116_v7, %v43_v6 }
  0x8b   :  { %v46_v9 = vmul.f32 %v116_v7, %v45_v8 }
  0x8d   :  { %v47_v10 = vmul.f32 0.5, %v46_v9 }
  0x8f   :  { %v48_v11 = vsub.f32 1.5, %v47_v10 }
  0x91   :  { %v49_v12 = vmul.f32 %v116_v7, %v48_v11 }
  0x93   :  { %v50_v13 = vmul.f32 %v49_v12, %v43_v6 }
  0x95   :  { %v52_v15 = vsel %vm51_vm1, %v43_v6, %v50_v13 }
  0x96   :  { %v55_v16 = vsel %vm53_vm2, %v54_v14, %v52_v15 }
  0x97   :  { %v57_v17 = vsub.f32 2.0, %v55_v16 }
  0x99   :  { %v58_v19 = vmax.f32 %v57_v17, 0.0 }
  0x9b   :  { %v61_v21 = vmul.f32 %v58_v19, %v58_v19 }
  0x9d   :  { %v62_v23 = vmul.f32 %v61_v21, %v60_v20 }
  0x9f   :  { %v63_v24 = vadd.f32 %v62_v23, %v59_v22 }
  0xa1   :  { %v73_v25 = vsel %vm72_vm3, %v63_v24, 0.0 }
  0xa2   :  { %74 = vadd.xlane.f32.xlu0 %v73_v25 }
 0x115   :  { %v75_v27 = vpop.xlane.xlu0 %74 }
 0x116   :  { %v76_v28 = vrot.slane %v75_v27, 4 }
 0x118   :  { %v77_v29 = vadd.f32 %v76_v28, %v75_v27 }
 0x11a   :  { %v78_v30 = vrot.slane %v77_v29, 2 }
 0x11c   :  { %v79_v31 = vadd.f32 %v78_v30, %v77_v29 }
 0x11e   :  { %v80_v32 = vrot.slane %v79_v31, 1 }
 0x120   :  { %v81_v33 = vadd.f32 %v80_v32, %v79_v31 }
 0x122   :  { %110 = vpush %v81_v33 }
 0x153   :  { %s111_s2 = spop %110 }
 0x154   :  { %v83_v35 = vstv %s111_s2 }
 0x155   :  { %v84_v36 = vadd.f32 %v83_v35, %v71_v34 }
 0x157   :  { %86 = vst.msk [vmem:[#allocation2] sm:$0x1] %vm33_vm4, %v84_v36 }
 0x15e   :  { %v90_v37 = vld [vmem:[#allocation2] sm:$0x1] }
 0x15f   :  { %v91_v38 = vmul.f32 0.125, %v90_v37 }
 0x161   :  { %92 = vst.msk [vmem:[#allocation6] sm:$0x1] %vm33_vm4, %v91_v38 }
 0x162   :  { %103 = dma.vmem_to_hbm [thread:$0]  %s99_s20, 16, %s101_s23, [#allocation5]  }
 0x163   :  { %167 = dma.done.wait [#allocation5], 16  }
 0x164   :  { %168 = vsyncadd [#allocation5], 4294967280 }
 0x165   :  { %108 = vsyncpa [#allocation4], 1 }
 0x166   :  { %109 = vsyncpa [#allocation5], 1 }

</bundles_post_ra>
